<compile_context>
chip_gen: v5e
topology: v5e:2x2
jax: 0.10.0
libtpu: 0.0.40
codegen_flags: <defaults>
</compile_context>

<pallas_src>
import functools
import math

import jax
import jax.numpy as jnp
from jax.experimental import pallas as pl
from jax.experimental.pallas import tpu as pltpu


def _round_up(x, m):
    return ((x + m - 1) // m) * m


def _vmem_cap_bytes():
    """Physical VMEM minus headroom for compiler scratch / pipeline buffers."""
    try:
        cap = pltpu.get_tpu_info().vmem_capacity_bytes
    except Exception:
        cap = 64 << 20  # conservative (v7x per-TC) if the query is unavailable
    return max(cap - (12 << 20), 32 << 20)


# ----------------------------------------------------------------------------
# Fused MLP kernel: x -> [dot + bias + relu]*(L-1) -> dot + bias
# refs = (x_ref, w0, b0, w1, b1, ..., w_{L-1}, b_{L-1}, o_ref)
# ----------------------------------------------------------------------------
def _fused_mlp_kernel(*refs, n_layers, compute_dtype):
    x_ref = refs[0]
    o_ref = refs[-1]
    wb = refs[1:-1]

    h = x_ref[...].astype(compute_dtype)          # bf16 into the MXU
    for layer in range(n_layers):
        w = wb[2 * layer][...]                    # (d_in, d_out), VMEM-resident
        b = wb[2 * layer + 1][...]                # (1, d_out), f32
        acc = jnp.dot(h, w, preferred_element_type=jnp.float32) + b  # f32 acc
        if layer < n_layers - 1:
            acc = jnp.maximum(acc, 0.0)           # f32 epilogue (VALU slot)
            h = acc.astype(compute_dtype)         # narrow only for next dot
        else:
            h = acc
    o_ref[...] = h.astype(o_ref.dtype)            # bf16 lane-dense writeback


def detector_forward(params, x, n_classes, *, tm_max=512):
    """Fused forward pass. `params` = [(w_t (in,out), b (1,out)), ...] with the
    hidden / final widths already padded to lane-dense multiples of 128."""
    M, K = x.shape
    n_layers = len(params)
    n_out_pad = params[-1][0].shape[1]
    compute_dtype = params[0][0].dtype            # bf16 (or f32 if so stored)
    out_store_dtype = jnp.bfloat16
    assert params[0][0].shape[0] == K, "x feature dim must match first weight"

    # --- M tiling: no input padding; cdiv grid with a masked boundary block.
    if M > tm_max:
        tm = tm_max
    elif M >= 16:
        # split so a v7x megacore has >= 2 grid steps to shard
        tm = _round_up(pl.cdiv(M, 2), 8)
    else:
        tm = M                                    # block == full dim (allowed)
    grid_m = pl.cdiv(M, tm)

    # --- specs / args: x tiled over the grid; weights/biases constant-indexed
    #     so they stay resident in VMEM for the whole kernel.
    in_specs = [pl.BlockSpec((tm, K), lambda i: (i, 0))]
    args = [x]
    flops = 0
    weight_bytes = 0
    max_width = K
    for (w_t, b) in params:
        d_in, d_out = w_t.shape
        in_specs.append(pl.BlockSpec((d_in, d_out), lambda i: (0, 0)))
        in_specs.append(pl.BlockSpec((1, d_out), lambda i: (0, 0)))
        args += [w_t, b]
        flops += 2 * M * d_in * d_out
        weight_bytes += d_in * d_out * w_t.dtype.itemsize + d_out * b.dtype.itemsize
        max_width = max(max_width, d_out)

    x_itemsize = x.dtype.itemsize
    out_itemsize = jnp.dtype(out_store_dtype).itemsize
    bytes_accessed = M * K * x_itemsize + weight_bytes + M * n_out_pad * out_itemsize

    # --- VMEM budget: double-buffered x/out tiles, double-buffered resident
    #     weights, plus headroom for f32 activation temporaries.
    vmem_bytes = (
        2 * tm * K * x_itemsize
        + 2 * weight_bytes
        + 2 * tm * n_out_pad * out_itemsize
        + 4 * tm * max_width * 4
    )
    vmem_limit = min(max(int(1.25 * vmem_bytes) + (4 << 20), 16 << 20),
                     _vmem_cap_bytes())

    kernel = functools.partial(
        _fused_mlp_kernel, n_layers=n_layers, compute_dtype=compute_dtype
    )

    out = pl.pallas_call(
        kernel,
        out_shape=jax.ShapeDtypeStruct((M, n_out_pad), out_store_dtype),
        grid_spec=pltpu.PrefetchScalarGridSpec(
            num_scalar_prefetch=0,
            grid=(grid_m,),
            in_specs=in_specs,
            out_specs=pl.BlockSpec((tm, n_out_pad), lambda i: (i, 0)),
        ),
        compiler_params=pltpu.CompilerParams(
            dimension_semantics=("parallel",),   # shards M across v7x's 2 TCs
            vmem_limit_bytes=vmem_limit,
        ),
        cost_estimate=pl.CostEstimate(
            flops=flops, transcendentals=0, bytes_accessed=bytes_accessed
        ),
    )(*args)

    return out[:, :n_classes].astype(jnp.float32)


# ----------------------------------------------------------------------------
# Parameter init (mirrors the PyTorch module: xavier_uniform weights, zero
# bias). Weights stored pre-transposed (in, out) in bf16; hidden and final
# widths zero-padded to multiples of 128 (numerically a no-op).
# ----------------------------------------------------------------------------
def init_detector(key, n_features=512, n_classes=2, n_layers=2, width_factor=1,
                  param_dtype=jnp.bfloat16):
    hidden = n_features // width_factor
    hidden_pad = _round_up(hidden, 128)
    out_pad = _round_up(n_classes, 128)

    # (true_in, true_out, padded_in, padded_out)
    dims = [(n_features, hidden, n_features, hidden_pad)]
    for _ in range(n_layers - 2):
        dims.append((hidden, hidden, hidden_pad, hidden_pad))
    dims.append((hidden, n_classes, hidden_pad, out_pad))

    params = []
    for (d_in, d_out, p_in, p_out) in dims:
        key, sub = jax.random.split(key)
        limit = math.sqrt(6.0 / (d_in + d_out))   # xavier_uniform
        w_t = jax.random.uniform(
            sub, (d_in, d_out), dtype=jnp.float32, minval=-limit, maxval=limit
        )
        w_t = jnp.pad(w_t, ((0, p_in - d_in), (0, p_out - d_out))).astype(param_dtype)
        b = jnp.zeros((1, p_out), dtype=jnp.float32)
        params.append((w_t, b))
    return params


# ----------------------------------------------------------------------------
# Pure-JAX reference mirroring the kernel's numerics (bf16 dot inputs,
# f32 accumulation/epilogue, bf16 output cast).
# ----------------------------------------------------------------------------
def detector_forward_ref(params, x, n_classes):
    compute_dtype = params[0][0].dtype
    h = x.astype(compute_dtype)
    n = len(params)
    for li, (w_t, b) in enumerate(params):
        acc = jnp.dot(h, w_t, preferred_element_type=jnp.float32) + b
        if li < n - 1:
            h = jnp.maximum(acc, 0.0).astype(compute_dtype)
        else:
            h = acc
    out = h.astype(jnp.bfloat16)
    return out[:, :n_classes].astype(jnp.float32)


# ----------------------------------------------------------------------------
if __name__ == "__main__":
    key = jax.random.PRNGKey(0)
    kp, kx = jax.random.split(key)

    # Small shapes consistent with the module (scaled down). batch=24 is not a
    # multiple of the chosen tile, so the masked boundary-block path is tested.
    batch = 24
    n_features = 128
    n_classes = 2
    n_layers = 3          # input->hidden, hidden->hidden, hidden->n_classes
    width_factor = 1

    params = init_detector(
        kp,
        n_features=n_features,
        n_classes=n_classes,
        n_layers=n_layers,
        width_factor=width_factor,
    )
    x = jax.random.normal(kx, (batch, n_features), dtype=jnp.float32)

    y = detector_forward(params, x, n_classes)
    y = jax.block_until_ready(y)

    y_ref = detector_forward_ref(params, x, n_classes)
    assert y.shape == (batch, n_classes)
    max_err = float(jnp.max(jnp.abs(y - y_ref)))
    assert jnp.allclose(y, y_ref, atol=1e-2, rtol=1e-2), f"max abs err {max_err}"

    print("KERNEL_OK")
</pallas_src>

<mosaic_0001>
module attributes {stable_mosaic.version = 11 : i64} {
  func.func @_fused_mlp_kernel(%arg0: i32, %arg1: memref<16x128xf32, #tpu.memory_space<vmem>>, %arg2: memref<128x128xbf16, #tpu.memory_space<vmem>>, %arg3: memref<1x128xf32, #tpu.memory_space<vmem>>, %arg4: memref<128x128xbf16, #tpu.memory_space<vmem>>, %arg5: memref<1x128xf32, #tpu.memory_space<vmem>>, %arg6: memref<128x128xbf16, #tpu.memory_space<vmem>>, %arg7: memref<1x128xf32, #tpu.memory_space<vmem>>, %arg8: memref<16x128xbf16, #tpu.memory_space<vmem>>) attributes {dimension_semantics = [#tpu.dimension_semantics<parallel>], iteration_bounds = array<i64: 2>, scalar_prefetch = 0 : i64, scratch_operands = 0 : i64, tpu.core_type = #tpu.core_type<tc>, window_params = [{transform_indices = @transform_0, window_bounds = array<i64: 16, 128>}, {pipeline_mode = #tpu.pipeline_mode<synchronous>, transform_indices = @transform_1, window_bounds = array<i64: 128, 128>}, {pipeline_mode = #tpu.pipeline_mode<synchronous>, transform_indices = @transform_2, window_bounds = array<i64: 1, 128>}, {pipeline_mode = #tpu.pipeline_mode<synchronous>, transform_indices = @transform_3, window_bounds = array<i64: 128, 128>}, {pipeline_mode = #tpu.pipeline_mode<synchronous>, transform_indices = @transform_4, window_bounds = array<i64: 1, 128>}, {pipeline_mode = #tpu.pipeline_mode<synchronous>, transform_indices = @transform_5, window_bounds = array<i64: 128, 128>}, {pipeline_mode = #tpu.pipeline_mode<synchronous>, transform_indices = @transform_6, window_bounds = array<i64: 1, 128>}, {transform_indices = @transform_7, window_bounds = array<i64: 16, 128>}]} {
    %c0 = arith.constant 0 : index
    %c0_0 = arith.constant 0 : index
    %0 = vector.load %arg1[%c0, %c0_0] : memref<16x128xf32, #tpu.memory_space<vmem>>, vector<16x128xf32>
    %1 = arith.truncf %0 : vector<16x128xf32> to vector<16x128xbf16>
    %c0_1 = arith.constant 0 : index
    %c0_2 = arith.constant 0 : index
    %2 = vector.load %arg2[%c0_1, %c0_2] : memref<128x128xbf16, #tpu.memory_space<vmem>>, vector<128x128xbf16>
    %c0_3 = arith.constant 0 : index
    %c0_4 = arith.constant 0 : index
    %3 = vector.load %arg3[%c0_3, %c0_4] : memref<1x128xf32, #tpu.memory_space<vmem>>, vector<1x128xf32>
    %cst = arith.constant dense<0.000000e+00> : vector<16x128xf32>
    %4 = tpu.matmul %1, %2, %cst {dimension_numbers = #tpu.dot_dimension_numbers<[1], [0], [0], [1], [0, 0, 1, 1], [], []>} : vector<16x128xbf16>, vector<128x128xbf16>, vector<16x128xf32> -> vector<16x128xf32>
    %5 = vector.broadcast %3 : vector<1x128xf32> to vector<16x128xf32>
    %6 = arith.addf %4, %5 : vector<16x128xf32>
    %cst_5 = arith.constant 0.000000e+00 : f32
    %7 = vector.broadcast %cst_5 : f32 to vector<16x128xf32>
    %8 = arith.maximumf %6, %7 : vector<16x128xf32>
    %9 = arith.truncf %8 : vector<16x128xf32> to vector<16x128xbf16>
    %c0_6 = arith.constant 0 : index
    %c0_7 = arith.constant 0 : index
    %10 = vector.load %arg4[%c0_6, %c0_7] : memref<128x128xbf16, #tpu.memory_space<vmem>>, vector<128x128xbf16>
    %c0_8 = arith.constant 0 : index
    %c0_9 = arith.constant 0 : index
    %11 = vector.load %arg5[%c0_8, %c0_9] : memref<1x128xf32, #tpu.memory_space<vmem>>, vector<1x128xf32>
    %cst_10 = arith.constant dense<0.000000e+00> : vector<16x128xf32>
    %12 = tpu.matmul %9, %10, %cst_10 {dimension_numbers = #tpu.dot_dimension_numbers<[1], [0], [0], [1], [0, 0, 1, 1], [], []>} : vector<16x128xbf16>, vector<128x128xbf16>, vector<16x128xf32> -> vector<16x128xf32>
    %13 = vector.broadcast %11 : vector<1x128xf32> to vector<16x128xf32>
    %14 = arith.addf %12, %13 : vector<16x128xf32>
    %cst_11 = arith.constant 0.000000e+00 : f32
    %15 = vector.broadcast %cst_11 : f32 to vector<16x128xf32>
    %16 = arith.maximumf %14, %15 : vector<16x128xf32>
    %17 = arith.truncf %16 : vector<16x128xf32> to vector<16x128xbf16>
    %c0_12 = arith.constant 0 : index
    %c0_13 = arith.constant 0 : index
    %18 = vector.load %arg6[%c0_12, %c0_13] : memref<128x128xbf16, #tpu.memory_space<vmem>>, vector<128x128xbf16>
    %c0_14 = arith.constant 0 : index
    %c0_15 = arith.constant 0 : index
    %19 = vector.load %arg7[%c0_14, %c0_15] : memref<1x128xf32, #tpu.memory_space<vmem>>, vector<1x128xf32>
    %cst_16 = arith.constant dense<0.000000e+00> : vector<16x128xf32>
    %20 = tpu.matmul %17, %18, %cst_16 {dimension_numbers = #tpu.dot_dimension_numbers<[1], [0], [0], [1], [0, 0, 1, 1], [], []>} : vector<16x128xbf16>, vector<128x128xbf16>, vector<16x128xf32> -> vector<16x128xf32>
    %21 = vector.broadcast %19 : vector<1x128xf32> to vector<16x128xf32>
    %22 = arith.addf %20, %21 : vector<16x128xf32>
    %23 = arith.truncf %22 : vector<16x128xf32> to vector<16x128xbf16>
    %c0_17 = arith.constant 0 : index
    %c0_18 = arith.constant 0 : index
    %24 = vector.load %arg8[%c0_17, %c0_18] : memref<16x128xbf16, #tpu.memory_space<vmem>>, vector<16x128xbf16>
    tpu.vector_store %arg8[%c0_17, %c0_18], %23 {strides = array<i32>} : memref<16x128xbf16, #tpu.memory_space<vmem>>, vector<16x128xbf16>,
    return
  }
  func.func @transform_0(%arg0: i32) -> (i32, i32) {
    %c0_i32 = arith.constant 0 : i32
    %c0_i32_0 = arith.constant 0 : i32
    return %arg0, %c0_i32 : i32, i32
  }
  func.func @transform_1(%arg0: i32) -> (i32, i32) {
    %c0_i32 = arith.constant 0 : i32
    %c0_i32_0 = arith.constant 0 : i32
    %c0_i32_1 = arith.constant 0 : i32
    return %c0_i32, %c0_i32_0 : i32, i32
  }
  func.func @transform_2(%arg0: i32) -> (i32, i32) {
    %c0_i32 = arith.constant 0 : i32
    %c0_i32_0 = arith.constant 0 : i32
    %c0_i32_1 = arith.constant 0 : i32
    return %c0_i32, %c0_i32_0 : i32, i32
  }
  func.func @transform_3(%arg0: i32) -> (i32, i32) {
    %c0_i32 = arith.constant 0 : i32
    %c0_i32_0 = arith.constant 0 : i32
    %c0_i32_1 = arith.constant 0 : i32
    return %c0_i32, %c0_i32_0 : i32, i32
  }
  func.func @transform_4(%arg0: i32) -> (i32, i32) {
    %c0_i32 = arith.constant 0 : i32
    %c0_i32_0 = arith.constant 0 : i32
    %c0_i32_1 = arith.constant 0 : i32
    return %c0_i32, %c0_i32_0 : i32, i32
  }
  func.func @transform_5(%arg0: i32) -> (i32, i32) {
    %c0_i32 = arith.constant 0 : i32
    %c0_i32_0 = arith.constant 0 : i32
    %c0_i32_1 = arith.constant 0 : i32
    return %c0_i32, %c0_i32_0 : i32, i32
  }
  func.func @transform_6(%arg0: i32) -> (i32, i32) {
    %c0_i32 = arith.constant 0 : i32
    %c0_i32_0 = arith.constant 0 : i32
    %c0_i32_1 = arith.constant 0 : i32
    return %c0_i32, %c0_i32_0 : i32, i32
  }
  func.func @transform_7(%arg0: i32) -> (i32, i32) {
    %c0_i32 = arith.constant 0 : i32
    %c0_i32_0 = arith.constant 0 : i32
    return %arg0, %c0_i32 : i32, i32
  }
}

</mosaic_0001>

<bundles_post_ra>
// kernel: tpu_custom_call.1
= control target key start
LH: loop header
LB: loop body
LE: loop exit
PB: predicated region body
PF: predicated region fallthrough
CT: control target
= control target key end

     0   :  { %s1483_s0 = inlined_call_operand.hbm [shape: f32[24,128], index: 0, kind: input, shape index: {}]   ;;  %s1484_s1 = inlined_call_operand.hbm [shape: bf16[128,128], index: 1, kind: input, shape index: {}]   ;;  %s1485_s2 = inlined_call_operand.vmem [shape: f32[1,128], index: 2, kind: input, shape index: {}]   ;;  %s1486_s3 = inlined_call_operand.hbm [shape: bf16[128,128], index: 3, kind: input, shape index: {}]   ;;  %s1487_s4 = inlined_call_operand.vmem [shape: f32[1,128], index: 4, kind: input, shape index: {}]   ;;  %s1488_s5 = inlined_call_operand.hbm [shape: bf16[128,128], index: 5, kind: input, shape index: {}]   ;;  %s1489_s6 = inlined_call_operand.vmem [shape: f32[1,128], index: 6, kind: input, shape index: {}]   ;;  %s1490_s7 = inlined_call_operand.hbm [shape: bf16[24,128], index: 7, kind: output, shape index: {}]  }
   0x1   :  { %1494 = sst [smem:[#allocation16_spill]] %s1484_s1 }
   0x2   :  { %1495 = sst [smem:[#allocation17_spill]] %s1486_s3 }
   0x3   :  { %12 = vsyncpa [#allocation3], 0 }
   0x4   :  { %14 = vsyncpa [#allocation3 + $0x1], 0 }
   0x5   :  { %15 = vsyncpa [#allocation6], 0 }
   0x6   :  { %16 = vsyncpa [#allocation9], 0 }
   0x7   :  { %17 = vsyncpa [#allocation4], 0 }
   0x8   :  { %19 = vsyncpa [#allocation4 + $0x1], 0  ;;  %s1251_s24 = smov 0   ;;  %s1253_s25 = smov 0  }
   0x9   :  { %s1255_s26 = smov 0   ;;  %s1257_s27 = smov 0  }
   0xa LB: > { %s1272_s28 = sadd.s32 4294967295, %s1198_s27   ;;  %s750_s29 = sadd.s32 4294967294, %s1198_s27   ;;  %s1198_s27 = sphi %s1257_s27, %s1518_s27   ;;  %s1194_s26 = sphi %s1255_s26, %s1517_s26   ;;  %s1190_s25 = sphi %s1253_s25, %s1516_s25   ;;  %s1186_s24 = sphi %s1251_s24, %s1515_s24  }
   0xb   : > { %s1276_s30 = sadd.s32 1, %s1198_s27   ;;  %s32_s8 = sadd.s32 1, %s1194_s26 }
   0xc   : > { %s29_s9 = ssub.s32 %s1198_s27, %s1276_s30  ;;  %p39_p0 = scmp.ne.s32.totalorder %s1194_s26, %s1190_s25 }
   0xd   : > { %p30_p1 = scmp.eq.s32.totalorder %s29_s9, 0  ;;  %p40_p2 = scmp.eq.s32.totalorder %s1198_s27, 0 }
   0xe   : > { %p45_p3 = scmp.ne.s32.totalorder %s1190_s25, %s1186_s24  ;;  %p1493_p4 = scmp.eq.s32.totalorder %s1272_s28, 0 }
   0xf   : > { %s1288_s10 = scalar_select %p30_p1, %s1194_s26, %s32_s8  }
  0x10   : > { %p1290_p5 = por %p40_p2, %p39_p0  ;;  %p1296_p6 = por %p1493_p4, %p45_p3 }
  0x11   : > { %1496 = sst [smem:[#allocation15_spill]] %s1288_s10  ;;  %p195_p7 = scmp.eq.s32.totalorder %s1272_s28, 1 }
  0x12   : > { %p201_p8 = scmp.eq.s32.totalorder %s750_s29, 1  ;;  %p751_p9 = scmp.ge.s32.totalorder %s1198_s27, 1 }
  0x13   : > { %p208_p10 = scmp.lt.s32.totalorder %s1198_s27, 3  ;;  %p1303_p11 = por %p195_p7, %p39_p0 }
  0x14   : > { %p1307_p12 = por %p201_p8, %p45_p3  ;;  %s1502_s1 = sld [smem:[#allocation16_spill]] }
  0x15   : > { %p1311_p13 = pnand %p751_p9, %p208_p10  ;;  %s1200_s19 = smov [#allocation5]  }
  0x16   : > { %s1500_s14 = scalar_select %p1307_p12, 1, 0 }
  0x17   : > { %p919_p1 = pneg %p1311_p13  ;;  %s221_s20 = sshll.u32 %s1200_s19, 4  ;;  %s222_s20 = int_to_ptr.vmem [resolvable:$true] %s221_s20 }
  0x18   : > { %s1504_s3 = sld [smem:[#allocation17_spill]]  ;;  %s1201_s8 = smov 64  }
  0x19   : > { %p1322_p0 = pnand %p919_p1, %p1493_p4  ;;  %s1202_s9 = smov 4  }
  0x1a   : > { %s219_s18 = sshll.u32 %s1502_s1, 4  ;;  %s253_s19 = sshll.u32 %s1488_s5, 4  ;;  %s220_s18 = int_to_ptr.hbm [resolvable:$true] %s219_s18  ;;  %s254_s19 = int_to_ptr.hbm [resolvable:$true] %s253_s19 }
  0x1b   : > { %922 = dma.hbm_to_vmem [thread:$0]  (!%p1322_p0), %s220_s18, 1024, %s222_s20, [#allocation6], %s1201_s8, %s1201_s8, %s1202_s9  }
  0x1c   : > { %s1203_s1 = smov [#allocation7]   ;;  %s1204_s22 = smov [#allocation8]  }
  0x1d   : > { %s238_s10 = sshll.u32 %s1203_s1, 4  ;;  %s255_s23 = sshll.u32 %s1204_s22, 4  ;;  %s239_s10 = int_to_ptr.vmem [resolvable:$true] %s238_s10  ;;  %s256_s23 = int_to_ptr.vmem [resolvable:$true] %s255_s23 }
  0x1e   : > { %s236_s29 = sshll.u32 %s1504_s3, 4  ;;  %p1492_p2 = scmp.ge.s32.totalorder %s1198_s27, 2  ;;  %s237_s29 = int_to_ptr.hbm [resolvable:$true] %s236_s29 }
  0x1f   : > { %925 = dma.hbm_to_vmem [thread:$0]  (!%p1322_p0), %s237_s29, 1024, %s239_s10, [#allocation6], %s1201_s8, %s1201_s8, %s1202_s9  }
  0x20   : > { %928 = dma.hbm_to_vmem [thread:$0]  (!%p1322_p0), %s254_s19, 1024, %s256_s23, [#allocation9], %s1201_s8, %s1201_s8, %s1202_s9  }
  0x21   : > { %268 = sbr.rel (%p1492_p2) target bundleno = 75 (0x4b), region = 40 }
  0x26   : > { %271 = sbr.rel (!%p1290_p5) target bundleno = 75 (0x4b), region = 44  ;;  %s272_s1 = sand.u32 (%p1290_p5), 1, %s1194_s26  }
  0x27   : > { %s757_s18 = sshll.u32 (%p1290_p5), %s1198_s27, 1  ;;  %s756_s20 = sshll.u32 (%p1290_p5), %s272_s1, 4 }
  0x28   : > { %s278_s16 = ssub.s32 (%p1290_p5), 3, %s757_s18  ;;  %s1348_s8 = scalar_lea.sflag (%p1290_p5), [#allocation3], %s272_s1 }
  0x29   : > { %p279_p3 = scmp.lt.s32.totalorder (%p1290_p5), %s278_s16, 2  ;;  %s276_s9 = scalar_lea.vmem (%p1290_p5), [#allocation2], %s756_s20 }
  0x2b   : > { %s1520_s16 = smov (!%p279_p3, %s278_s16), 2 }
  0x2c   : > { %s758_s10 = sshll.u32 %s1520_s16, 3 }
  0x2d   : > { %s282_s21 = ssub.s32 16, %s758_s10 }
  0x2e   : > { %s283_s29 = sshll.u32 %s282_s21, 4 }
  0x2f   : > { %284 = vsyncadd %s1348_s8, %s283_s29  ;;  %p1351_p5 = scmp.ne.s32.totalorder %s758_s10, 0  ;;  %s874_s17 = sshll.u32 %s1198_s27, 4 }
  0x30   : > { %s287_s23 = scalar_lea.hbm %s1483_s0, %s874_s17  ;;  %s1359_s18 = sshll.u32 %s276_s9, 4  ;;  %s292_s18 = int_to_ptr.vmem [resolvable:$true] %s1359_s18 }
  0x31   : > { %s289_s1 = sshll.u32 %s287_s23, 4  ;;  %s1491_s20 = sshll.u32 %s1520_s16, 7  ;;  %s1362_s1 = int_to_ptr.hbm [resolvable:$true] %s289_s1 }
  0x32   : > { %s1074_s21 = sshra.s32 %s1362_s1, 4  ;;  %s1076_s10 = sshrl.u32 %s1491_s20, 4  ;;  %s1075_s21 = int_to_ptr.hbm [resolvable:$true] %s1074_s21 }
  0x33   : > { %s1081_s29 = scalar_lea.hbm %s1075_s21, %s1076_s10  ;;  %s1085_s9 = scalar_lea.hbm %s1483_s0, 24 }
  0x34   : > { %p1082_p7 = scmp.ne.s32.totalorder %s1075_s21, %s1081_s29  ;;  %p1086_p10 = scmp.lt.s32.totalorder %s1075_s21, %s1483_s0 }
  0x35   : > { %p1087_p1 = scmp.lt.s32.totalorder %s1085_s9, %s1081_s29 }
  0x36   : > { %p1083_p8 = pnand %p1082_p7, %p1351_p5 }
  0x37   : > { %p1088_p0 = por %p1087_p1, %p1086_p10 }
  0x38   : > { %p1084_p9 = pneg %p1083_p8 }
  0x3a   : > { %p1089_p3 = pnand %p1088_p0, %p1084_p9 }
  0x3c   : > { %1092 = shalt.err (!%p1089_p3)
}
  0x3d   : > { %s1093_s20 = sshra.s32 %s292_s18, 4  ;;  %s1205_s19 = smov [#allocation2]   ;;  %s1094_s20 = int_to_ptr.vmem [resolvable:$true] %s1093_s20 }
  0x3e   : > { %s1100_s3 = scalar_lea.vmem %s1094_s20, %s1076_s10  ;;  %s1104_s17 = scalar_lea.vmem %s1205_s19, 32 }
  0x3f   : > { %p1101_p7 = scmp.ne.s32.totalorder %s1094_s20, %s1100_s3  ;;  %p1106_p4 = scmp.lt.s32.totalorder %s1104_s17, %s1100_s3 }
  0x41   : > { %p1102_p8 = pnand %p1101_p7, %p1351_p5 }
  0x43   : > { %p1103_p2 = pneg %p1102_p8 }
  0x45   : > { %p1108_p12 = pnand %p1106_p4, %p1103_p2 }
  0x47   : > { %1111 = shalt.err (!%p1108_p12)
}
  0x48   : > { %s1206_s21 = smov 128   ;;  %s1207_s29 = smov 8  }
  0x49   : > { %s1506_s9 = sshll.u32 %s1520_s16, 7 }
  0x4a   : > { %297 = dma.hbm_to_vmem [thread:$0]  (%p1351_p5), %s1362_s1, %s1506_s9, %s292_s18, %s1348_s8, %s1206_s21, %s1206_s21, %s1207_s29  }
  0x4b PF: > { %303 = sbr.rel (%p1311_p13) target bundleno = 575 (0x23f), region = 48  ;;  %s1391_s3 = sand.u32 (!%p1311_p13), 1, %s1190_s25  }
  0x4c   : > { %s764_s20 = sshll.u32 (!%p1311_p13), %s1391_s3, 4  ;;  %s306_s10 = scalar_lea.sflag (!%p1311_p13), [#allocation3], %s1391_s3 }
  0x4d   : > { %s1395_s22 = scalar_lea.vmem (!%p1311_p13), [#allocation2], %s764_s20 }
  0x50   : > { %1169 = dma.done.wait (%p1296_p6), %s306_s10, 256  }
  0x51   : > { %1171 = vsyncadd (%p1296_p6), %s306_s10, 4294967040  ;;  %p1507_p4 = scmp.eq.s32.totalorder %s1272_s28, 0 }
  0x53   : > { %1173 = dma.done.wait (%p1507_p4), [#allocation6], 2048   ;;  %p1508_p12 = pmov %p1507_p4 }
  0x54   : > { %p1509_p13 = pmov %p1507_p4 }
  0x55   : > { %1175 = vsyncadd (%p1508_p12), [#allocation6], 4294965248 }
  0x56   : > { %1177 = dma.done.wait (%p1509_p13), [#allocation9], 1024   ;;  %p1510_p2 = pmov %p1507_p4 }
  0x57   : > { %v882_v0 = vld [vmem:[#allocation5 + $0x38] sm:$0xff]  ;;  %v881_v1 = vld [vmem:[#allocation5 + $0x30] sm:$0xff]  ;;  %v880_v4 = vld [vmem:[#allocation5 + $0x28] sm:$0xff]  ;;  %s768_s1 = sshll.u32 %s1391_s3, 3  ;;  %s626_s19 = scalar_lea.sflag [#allocation4], %s1391_s3 }
  0x58   : > { %1179 = vsyncadd (%p1510_p2), [#allocation9], 4294966272  ;;  %437 = vmatpush.bf16.msra.mxu0 %v882_v0  ;;  %v890_v2 = vld [vmem:[#allocation7 + $0x38] sm:$0xff]  ;;  %v889_v3 = vld [vmem:[#allocation7 + $0x30] sm:$0xff]  ;;  %s355_s23 = scalar_lea.vmem [#allocation10], %s768_s1  ;;  %s866_s17 = sshll.u32 (%p1303_p11), %s1272_s28, 1 }
  0x59   : > { %522 = vmatpush.bf16.msra.mxu1 %v890_v2  ;;  %v888_v5 = vld [vmem:[#allocation7 + $0x28] sm:$0xff]  ;;  %v879_v6 = vld [vmem:[#allocation5 + $0x20] sm:$0xff]  ;;  %v878_v8 = vld [vmem:[#allocation5 + $0x18] sm:$0xff]  ;;  %s634_s21 = ssub.s32 (%p1303_p11), 3, %s866_s17 }
  0x5a   : > { %v887_v7 = vld [vmem:[#allocation7 + $0x20] sm:$0xff]  ;;  %v877_v9 = vld [vmem:[#allocation5 + $0x10] sm:$0xff]  ;;  %v876_v10 = vld [vmem:[#allocation5 + $0x8] sm:$0xff]  ;;  %p635_p6 = scmp.lt.s32.totalorder (%p1303_p11), %s634_s21, 2 }
  0x5b   : > { %v875_v11 = vld [vmem:[#allocation5] sm:$0xff]  ;;  %v367_v13 = vld [vmem:[%s1395_s22 + $0x8] sm:$0xff]  ;;  %v885_v16 = vld [vmem:[#allocation7 + $0x10] sm:$0xff] }
  0x5c   : > { %438 = vmatpush.bf16.msra.mxu0 %v881_v1  ;;  %v366_v12 = vld [vmem:[%s1395_s22] sm:$0xff]  ;;  %v886_v15 = vld [vmem:[#allocation7 + $0x18] sm:$0xff]  ;;  %v884_v17 = vld [vmem:[#allocation7 + $0x8] sm:$0xff] }
  0x5d   : > { %523 = vmatpush.bf16.msra.mxu1 %v889_v3  ;;  %v368_v14 = vpack.c.bf16 %v367_v13, %v366_v12  ;;  %v883_v18 = vld [vmem:[#allocation7] sm:$0xff]  ;;  %v898_v19 = vld [vmem:[#allocation8 + $0x38] sm:$0xff]  ;;  %v897_v20 = vld [vmem:[#allocation8 + $0x30] sm:$0xff] }
  0x5e   : > { %607 = vmatpush.bf16.msra.mxu2 %v898_v19  ;;  %v896_v21 = vld [vmem:[#allocation8 + $0x28] sm:$0xff]  ;;  %v895_v22 = vld [vmem:[#allocation8 + $0x20] sm:$0xff]  ;;  %v894_v31 = vld [vmem:[#allocation8 + $0x18] sm:$0xff] }
  0x5f   : > { %v981_v24 = vld [vmem:[%s1485_s2] ss:$0 sm:$0xff]  ;;  %v893_v32 = vld [vmem:[#allocation8 + $0x10] sm:$0xff]  ;;  %v892_v33 = vld [vmem:[#allocation8 + $0x8] sm:$0xff] }
  0x60   : > { %439 = vmatpush.bf16.msra.mxu0 %v880_v4  ;;  %v891_v34 = vld [vmem:[#allocation8] sm:$0xff] }
  0x61   : > { %524 = vmatpush.bf16.msra.mxu1 %v888_v5  ;;  %v982_v36 = vld [vmem:[%s1487_s4] ss:$0 sm:$0xff] }
  0x62   : > { %608 = vmatpush.bf16.msra.mxu2 %v897_v20  ;;  %v983_v44 = vld [vmem:[%s1489_s6] ss:$0 sm:$0xff] }
  0x64   : > { %440 = vmatpush.bf16.msra.mxu0 %v879_v6 }
  0x65   : > { %525 = vmatpush.bf16.msra.mxu1 %v887_v7 }
  0x66   : > { %609 = vmatpush.bf16.msra.mxu2 %v896_v21 }
  0x68   : > { %441 = vmatpush.bf16.msra.mxu0 %v878_v8 }
  0x69   : > { %526 = vmatpush.bf16.msra.mxu1 %v886_v15 }
  0x6a   : > { %610 = vmatpush.bf16.msra.mxu2 %v895_v22 }
  0x6c   : > { %442 = vmatpush.bf16.msra.mxu0 %v877_v9 }
  0x6d   : > { %527 = vmatpush.bf16.msra.mxu1 %v885_v16 }
  0x6e   : > { %611 = vmatpush.bf16.msra.mxu2 %v894_v31 }
  0x70   : > { %443 = vmatpush.bf16.msra.mxu0 %v876_v10 }
  0x71   : > { %528 = vmatpush.bf16.msra.mxu1 %v884_v17 }
  0x72   : > { %612 = vmatpush.bf16.msra.mxu2 %v893_v32 }
  0x74   : > { %444 = vmatpush.bf16.msra.mxu0 %v875_v11 }
  0x75   : > { %529 = vmatpush.bf16.msra.mxu1 %v883_v18 }
  0x76   : > { %613 = vmatpush.bf16.msra.mxu2 %v892_v33 }
  0x77   : > { %445 = vmatmul.bf16.vlgmr.msra.gmra.mxu0 %v368_v14 }
  0x7a   : > { %614 = vmatpush.bf16.msra.mxu2 %v891_v34 }
  0xf4   : > { %v446_v23 = vpop.f32.mrf.mxu0 }
  0xf5   : > { %v447_v25 = vadd.f32 %v981_v24, %v446_v23 }
  0xf7   : > { %v451_v28 = vmax.f32 %v447_v25, 0.0 }
  0xfc   : > { %v448_v26 = vpop.f32.mrf.mxu0 }
  0xfd   : > { %v449_v27 = vadd.f32 %v981_v24, %v448_v26 }
  0xff   : > { %v452_v29 = vmax.f32 %v449_v27, 0.0 }
 0x101   : > { %v453_v30 = vpack.c.bf16 %v452_v29, %v451_v28 }
 0x103   : > { %530 = vmatmul.bf16.vlgmr.msra.gmra.mxu1 %v453_v30 }
 0x180   : > { %v531_v35 = vpop.f32.mrf.mxu1 }
 0x181   : > { %v532_v37 = vadd.f32 %v982_v36, %v531_v35 }
 0x183   : > { %v536_v40 = vmax.f32 %v532_v37, 0.0 }
 0x188   : > { %v533_v38 = vpop.f32.mrf.mxu1 }
 0x189   : > { %v534_v39 = vadd.f32 %v982_v36, %v533_v38 }
 0x18b   : > { %v537_v41 = vmax.f32 %v534_v39, 0.0 }
 0x18d   : > { %v538_v42 = vpack.c.bf16 %v537_v41, %v536_v40 }
 0x18f   : > { %615 = vmatmul.bf16.vlgmr.msra.gmra.mxu2 %v538_v42 }
 0x212   : > { %v616_v43 = vpop.f32.mrf.mxu2 }
 0x213   : > { %v617_v46 = vadd.f32 %v983_v44, %v616_v43 }
 0x21a   : > { %v618_v45 = vpop.f32.mrf.mxu2 }
 0x21b   : > { %v619_v47 = vadd.f32 %v983_v44, %v618_v45  ;;  %632 = sbr.rel (!%p1303_p11) target bundleno = 575 (0x23f), region = 68 }
 0x21d   : > { %v903_v48 = vpack.c.bf16 %v619_v47, %v617_v46 }
 0x21f   : > { %904 = vst [vmem:[%s355_s23] sm:$0xff] %v903_v48  }
 0x220   : > { %s1522_s21 = smov (!%p635_p6, %s634_s21), 2 }
 0x221   : > { %s867_s29 = sshll.u32 %s1522_s21, 2 }
 0x222   : > { %s638_s9 = ssub.s32 8, %s867_s29 }
 0x223   : > { %s639_s20 = sshll.u32 %s638_s9, 4 }
 0x224   : > { %640 = vsyncadd %s626_s19, %s639_s20  ;;  %p1430_p5 = scmp.ne.s32.totalorder %s867_s29, 0  ;;  %s899_s13 = sshll.u32 %s1272_s28, 3 }
 0x225   : > { %s643_s15 = scalar_lea.hbm %s1490_s7, %s899_s13  ;;  %s645_s16 = sshll.u32 %s355_s23, 4  ;;  %s1438_s16 = int_to_ptr.vmem [resolvable:$true] %s645_s16 }
 0x226   : > { %s647_s8 = sshll.u32 %s643_s15, 4  ;;  %s871_s11 = sshll.u32 %s1522_s21, 6  ;;  %s1440_s8 = int_to_ptr.hbm [resolvable:$true] %s647_s8 }
 0x227   : > { %s1113_s18 = sshra.s32 %s1438_s16, 4  ;;  %s1115_s1 = sshrl.u32 %s871_s11, 4  ;;  %s1114_s18 = int_to_ptr.vmem [resolvable:$true] %s1113_s18 }
 0x228   : > { %s1120_s17 = scalar_lea.vmem %s1114_s18, %s1115_s1  ;;  %s1208_s28 = smov [#allocation10]  }
 0x229   : > { %p1121_p11 = scmp.ne.s32.totalorder %s1114_s18, %s1120_s17  ;;  %s1124_s29 = scalar_lea.vmem %s1208_s28, 16 }
 0x22a   : > { %p1126_p1 = scmp.lt.s32.totalorder %s1124_s29, %s1120_s17 }
 0x22b   : > { %p1122_p9 = pnand %p1121_p11, %p1430_p5 }
 0x22d   : > { %p1123_p10 = pneg %p1122_p9 }
 0x22f   : > { %p1128_p0 = pnand %p1126_p1, %p1123_p10 }
 0x231   : > { %1131 = shalt.err (!%p1128_p0)
}
 0x232   : > { %s1132_s23 = sshra.s32 %s1440_s8, 4  ;;  %s1143_s22 = scalar_lea.hbm %s1490_s7, 12  ;;  %s1133_s23 = int_to_ptr.hbm [resolvable:$true] %s1132_s23 }
 0x233   : > { %s1139_s9 = scalar_lea.hbm %s1133_s23, %s1115_s1  ;;  %p1144_p4 = scmp.lt.s32.totalorder %s1133_s23, %s1490_s7 }
 0x234   : > { %p1140_p3 = scmp.ne.s32.totalorder %s1133_s23, %s1139_s9  ;;  %p1145_p12 = scmp.lt.s32.totalorder %s1143_s22, %s1139_s9 }
 0x236   : > { %p1141_p7 = pnand %p1140_p3, %p1430_p5  ;;  %p1146_p13 = por %p1145_p12, %p1144_p4 }
 0x238   : > { %p1142_p8 = pneg %p1141_p7 }
 0x23a   : > { %p1147_p2 = pnand %p1146_p13, %p1142_p8 }
 0x23c   : > { %1150 = shalt.err (!%p1147_p2)
}
 0x23d   : > { %s1209_s18 = smov 64   ;;  %s1210_s1 = smov 4  }
 0x23e   : > { %653 = dma.vmem_to_hbm [thread:$0]  (%p1430_p5), %s1438_s16, %s871_s11, %s1440_s8, %s626_s19, %s1209_s18, %s1209_s18, %s1210_s1  }
 0x23f PF: > { %s662_s17 = sand.u32 1, %s1186_s24   ;;  %p1512_p6 = scmp.ne.s32.totalorder %s1500_s14, 0 }
 0x240   : > { %p1513_p11 = scmp.ge.s32.totalorder %s1198_s27, 2  ;;  %s663_s28 = scalar_lea.sflag [#allocation4], %s662_s17 }
 0x242   : > { %p930_p9 = pnand %p1513_p11, %p1512_p6 }
 0x244   : > { %p931_p10 = pneg %p930_p9 }
 0x246   : > { %1181 = dma.done.wait (%p931_p10), %s663_s28, 128  }
 0x247   : > { %1183 = vsyncadd (%p931_p10), %s663_s28, 4294967168  ;;  %s1514_s10 = sld [smem:[#allocation15_spill]]  ;;  %p22_p1 = scmp.ge.s32.totalorder %s1276_s30, 4  }
 0x248   : > { %s1515_s24 = smov %s1190_s25  ;;  %s1516_s25 = smov %s1194_s26 }
 0x249   : > { %s1518_s27 = smov %s1276_s30  ;;  %24 = sbr.rel (!%p22_p1) target bundleno = 10 (0xa), region = 105 }
 0x24d   : > { %s1517_s26 = smov %s1514_s10 }
 0x24e   :  { %669 = vsyncpa [#allocation3], 1 }
 0x24f   :  { %671 = vsyncpa [#allocation3 + $0x1], 1 }
 0x250   :  { %672 = vsyncpa [#allocation6], 1 }
 0x251   :  { %673 = vsyncpa [#allocation9], 1 }
 0x252   :  { %674 = vsyncpa [#allocation4], 1 }
 0x253   :  { %676 = vsyncpa [#allocation4 + $0x1], 1 }

</bundles_post_ra>
